<compile_context>
chip_gen: v6e
topology: v6e:2x2x1
jax: 0.10.0
libtpu: 0.0.40
codegen_flags: <defaults>
</compile_context>

<pallas_src>
import jax
import jax.numpy as jnp
from jax.experimental import pallas as pl
from jax.experimental.pallas import tpu as pltpu

# ----- normalization constants (the (min, max) tuples of the torch module) ---
X_NORM = (-1.0, 1.0)   # x_norm
P_NORM = (0.0, 2.0)    # p_norm


def _network_kernel(xp_ref, w1t_ref, b1_ref, w2t_ref, b2_ref, o_ref):
    # xp_ref : (F, TB)  -- batch on the lane axis (lane-dense)
    # w1t_ref: (H, F)   b1_ref: (H, 1)
    # w2t_ref: (xd, H)  b2_ref: (xd, 1)
    # o_ref  : (xd, TB)
    h = jnp.tanh(
        jnp.dot(w1t_ref[...], xp_ref[...], preferred_element_type=jnp.float32)
        + b1_ref[...])
    o_ref[...] = (
        jnp.dot(w2t_ref[...], h, preferred_element_type=jnp.float32)
        + b2_ref[...])


def network_forward(x, p, w1, b1, w2, b2, *, block_b=512):
    """x: (B, xd), p: (B, pd); net = MLP((xd+pd)->H) -> tanh -> (H->xd)."""
    B, xd = x.shape
    _, pd = p.shape
    F = xd + pd
    H = w1.shape[1]
    assert w1.shape == (F, H)
    assert w2.shape == (H, xd)

    x_lo, x_hi = X_NORM
    p_lo, p_hi = P_NORM

    # ---- fold normalization / de-normalization into the (tiny) weights -----
    # input_norm = input * s - lo * s   (per feature)
    s = jnp.concatenate([jnp.full((xd,), 1.0 / (x_hi - x_lo), jnp.float32),
                         jnp.full((pd,), 1.0 / (p_hi - p_lo), jnp.float32)])
    lo = jnp.concatenate([jnp.full((xd,), x_lo, jnp.float32),
                          jnp.full((pd,), p_lo, jnp.float32)])
    w1f = w1 * s[:, None]                    # (F, H)
    b1f = b1 - (lo * s) @ w1                 # (H,)
    w2f = w2 * (x_hi - x_lo)                 # (H, xd)
    b2f = b2 * (x_hi - x_lo) + x_lo          # (xd,)

    # ---- transposed / lane-dense layout -------------------------------------
    w1t = jnp.asarray(w1f.T, jnp.float32)            # (H, F)
    w2t = jnp.asarray(w2f.T, jnp.float32)            # (xd, H)
    b1c = jnp.asarray(b1f, jnp.float32).reshape(H, 1)
    b2c = jnp.asarray(b2f, jnp.float32).reshape(xd, 1)

    # single concatenated, transposed input slab: (F, B), batch on lanes
    xp_t = jnp.concatenate([x, p], axis=-1).T.astype(jnp.float32)

    # ---- batch tiling --------------------------------------------------------
    TB = min(block_b, B)
    n_blk = pl.cdiv(B, TB)
    B_pad = n_blk * TB
    if B_pad != B:
        xp_t = jnp.pad(xp_t, ((0, 0), (0, B_pad - B)))

    out_t = pl.pallas_call(
        _network_kernel,
        out_shape=jax.ShapeDtypeStruct((xd, B_pad), jnp.float32),
        grid=(n_blk,),
        in_specs=[
            pl.BlockSpec((F, TB), lambda i: (0, i)),    # xp (tiled over batch)
            pl.BlockSpec((H, F), lambda i: (0, 0)),     # W1' (VMEM-resident)
            pl.BlockSpec((H, 1), lambda i: (0, 0)),     # b1'
            pl.BlockSpec((xd, H), lambda i: (0, 0)),    # W2'
            pl.BlockSpec((xd, 1), lambda i: (0, 0)),    # b2'
        ],
        out_specs=pl.BlockSpec((xd, TB), lambda i: (0, i)),
        compiler_params=pltpu.CompilerParams(
            dimension_semantics=("parallel",)),
    )(xp_t, w1t, b1c, w2t, b2c)

    return out_t[:, :B].T                               # back to (B, xd)


def _reference(x, p, w1, b1, w2, b2):
    x_lo, x_hi = X_NORM
    p_lo, p_hi = P_NORM
    xn = (x - x_lo) / (x_hi - x_lo)
    pn = (p - p_lo) / (p_hi - p_lo)
    inp = jnp.concatenate([xn, pn], axis=-1)
    h = jnp.tanh(inp @ w1 + b1)
    yn = h @ w2 + b2
    return yn * (x_hi - x_lo) + x_lo


if __name__ == "__main__":
    key = jax.random.PRNGKey(0)
    kx, kp, k1, k2, k3, k4 = jax.random.split(key, 6)

    # small feature sizes; batch big enough to exercise the tiled/pipelined path
    B, xd, pd, H = 1024, 8, 8, 32

    x = jax.random.normal(kx, (B, xd), dtype=jnp.float32)
    p = jax.random.uniform(kp, (B, pd), dtype=jnp.float32,
                           minval=0.0, maxval=2.0)

    # deterministic parameter init for the wrapped MLP
    w1 = jax.random.normal(k1, (xd + pd, H), dtype=jnp.float32) * 0.1
    b1 = jax.random.normal(k2, (H,), dtype=jnp.float32) * 0.1
    w2 = jax.random.normal(k3, (H, xd), dtype=jnp.float32) * 0.1
    b2 = jax.random.normal(k4, (xd,), dtype=jnp.float32) * 0.1

    out = jax.block_until_ready(network_forward(x, p, w1, b1, w2, b2))
    ref = _reference(x, p, w1, b1, w2, b2)

    assert out.shape == (B, xd)
    max_err = float(jnp.max(jnp.abs(out - ref)))
    # tolerance covers MXU vs XLA f32-matmul precision differences
    assert jnp.allclose(out, ref, atol=1e-3, rtol=1e-3), max_err

    print("KERNEL_OK")
</pallas_src>

<mosaic_0001>
module attributes {stable_mosaic.version = 11 : i64} {
  func.func @_network_kernel(%arg0: i32, %arg1: memref<16x512xf32, #tpu.memory_space<vmem>>, %arg2: memref<32x16xf32, #tpu.memory_space<vmem>>, %arg3: memref<32x1xf32, #tpu.memory_space<vmem>>, %arg4: memref<8x32xf32, #tpu.memory_space<vmem>>, %arg5: memref<8x1xf32, #tpu.memory_space<vmem>>, %arg6: memref<8x512xf32, #tpu.memory_space<vmem>>) attributes {dimension_semantics = [#tpu.dimension_semantics<parallel>], iteration_bounds = array<i64: 2>, scalar_prefetch = 0 : i64, scratch_operands = 0 : i64, tpu.core_type = #tpu.core_type<tc>, window_params = [{transform_indices = @transform_0, window_bounds = array<i64: 16, 512>}, {pipeline_mode = #tpu.pipeline_mode<synchronous>, transform_indices = @transform_1, window_bounds = array<i64: 32, 16>}, {pipeline_mode = #tpu.pipeline_mode<synchronous>, transform_indices = @transform_2, window_bounds = array<i64: 32, 1>}, {pipeline_mode = #tpu.pipeline_mode<synchronous>, transform_indices = @transform_3, window_bounds = array<i64: 8, 32>}, {pipeline_mode = #tpu.pipeline_mode<synchronous>, transform_indices = @transform_4, window_bounds = array<i64: 8, 1>}, {transform_indices = @transform_5, window_bounds = array<i64: 8, 512>}]} {
    %c0 = arith.constant 0 : index
    %c0_0 = arith.constant 0 : index
    %0 = vector.load %arg2[%c0, %c0_0] : memref<32x16xf32, #tpu.memory_space<vmem>>, vector<32x16xf32>
    %c0_1 = arith.constant 0 : index
    %c0_2 = arith.constant 0 : index
    %1 = vector.load %arg1[%c0_1, %c0_2] : memref<16x512xf32, #tpu.memory_space<vmem>>, vector<16x512xf32>
    %cst = arith.constant dense<0.000000e+00> : vector<32x512xf32>
    %2 = tpu.matmul %0, %1, %cst {dimension_numbers = #tpu.dot_dimension_numbers<[1], [0], [0], [1], [0, 0, 1, 1], [], []>} : vector<32x16xf32>, vector<16x512xf32>, vector<32x512xf32> -> vector<32x512xf32>
    %c0_3 = arith.constant 0 : index
    %c0_4 = arith.constant 0 : index
    %3 = vector.load %arg3[%c0_3, %c0_4] : memref<32x1xf32, #tpu.memory_space<vmem>>, vector<32x1xf32>
    %4 = vector.broadcast %3 : vector<32x1xf32> to vector<32x512xf32>
    %5 = arith.addf %2, %4 : vector<32x512xf32>
    %6 = math.tanh %5 : vector<32x512xf32>
    %c0_5 = arith.constant 0 : index
    %c0_6 = arith.constant 0 : index
    %7 = vector.load %arg4[%c0_5, %c0_6] : memref<8x32xf32, #tpu.memory_space<vmem>>, vector<8x32xf32>
    %cst_7 = arith.constant dense<0.000000e+00> : vector<8x512xf32>
    %8 = tpu.matmul %7, %6, %cst_7 {dimension_numbers = #tpu.dot_dimension_numbers<[1], [0], [0], [1], [0, 0, 1, 1], [], []>} : vector<8x32xf32>, vector<32x512xf32>, vector<8x512xf32> -> vector<8x512xf32>
    %c0_8 = arith.constant 0 : index
    %c0_9 = arith.constant 0 : index
    %9 = vector.load %arg5[%c0_8, %c0_9] : memref<8x1xf32, #tpu.memory_space<vmem>>, vector<8x1xf32>
    %10 = vector.broadcast %9 : vector<8x1xf32> to vector<8x512xf32>
    %11 = arith.addf %8, %10 : vector<8x512xf32>
    %c0_10 = arith.constant 0 : index
    %c0_11 = arith.constant 0 : index
    %12 = vector.load %arg6[%c0_10, %c0_11] : memref<8x512xf32, #tpu.memory_space<vmem>>, vector<8x512xf32>
    tpu.vector_store %arg6[%c0_10, %c0_11], %11 {strides = array<i32>} : memref<8x512xf32, #tpu.memory_space<vmem>>, vector<8x512xf32>,
    return
  }
  func.func @transform_0(%arg0: i32) -> (i32, i32) {
    %c0_i32 = arith.constant 0 : i32
    %c0_i32_0 = arith.constant 0 : i32
    return %c0_i32, %arg0 : i32, i32
  }
  func.func @transform_1(%arg0: i32) -> (i32, i32) {
    %c0_i32 = arith.constant 0 : i32
    %c0_i32_0 = arith.constant 0 : i32
    %c0_i32_1 = arith.constant 0 : i32
    return %c0_i32, %c0_i32_0 : i32, i32
  }
  func.func @transform_2(%arg0: i32) -> (i32, i32) {
    %c0_i32 = arith.constant 0 : i32
    %c0_i32_0 = arith.constant 0 : i32
    %c0_i32_1 = arith.constant 0 : i32
    return %c0_i32, %c0_i32_0 : i32, i32
  }
  func.func @transform_3(%arg0: i32) -> (i32, i32) {
    %c0_i32 = arith.constant 0 : i32
    %c0_i32_0 = arith.constant 0 : i32
    %c0_i32_1 = arith.constant 0 : i32
    return %c0_i32, %c0_i32_0 : i32, i32
  }
  func.func @transform_4(%arg0: i32) -> (i32, i32) {
    %c0_i32 = arith.constant 0 : i32
    %c0_i32_0 = arith.constant 0 : i32
    %c0_i32_1 = arith.constant 0 : i32
    return %c0_i32, %c0_i32_0 : i32, i32
  }
  func.func @transform_5(%arg0: i32) -> (i32, i32) {
    %c0_i32 = arith.constant 0 : i32
    %c0_i32_0 = arith.constant 0 : i32
    return %c0_i32, %arg0 : i32, i32
  }
}

</mosaic_0001>

<bundles_post_ra>
// kernel: tpu_custom_call.1
= control target key start
LH: loop header
LB: loop body
LE: loop exit
PB: predicated region body
PF: predicated region fallthrough
CT: control target
= control target key end

     0   :  { %10 = vsyncpa [#allocation3], 0  ;;  %s1159_s0 = inlined_call_operand.hbm [shape: f32[16,1024], index: 0, kind: input, shape index: {}]   ;;  %s1160_s1 = inlined_call_operand.vmem [shape: f32[32,16], index: 1, kind: input, shape index: {}]   ;;  %s1161_s2 = inlined_call_operand.vmem [shape: f32[32,1], index: 2, kind: input, shape index: {}]   ;;  %s1162_s3 = inlined_call_operand.vmem [shape: f32[8,32], index: 3, kind: input, shape index: {}]   ;;  %s1163_s4 = inlined_call_operand.vmem [shape: f32[8,1], index: 4, kind: input, shape index: {}]   ;;  %s1164_s5 = inlined_call_operand.hbm [shape: f32[8,1024], index: 5, kind: output, shape index: {}]  }
   0x1   :  { %12 = vsyncpa [#allocation3 + $0x1], 0 }
   0x2   :  { %13 = vsyncpa [#allocation4], 0 }
   0x3   :  { %15 = vsyncpa [#allocation4 + $0x1], 0  ;;  %s972_s18 = smov 0   ;;  %s974_s19 = smov 0  }
   0x4   :  { %s976_s20 = smov 0   ;;  %s978_s21 = smov 0  }
   0x5 LB: > { %s993_s22 = sadd.s32 4294967295, %s933_s21   ;;  %s730_s23 = sadd.s32 4294967294, %s933_s21   ;;  %s933_s21 = sphi %s978_s21, %s1180_s21   ;;  %s929_s20 = sphi %s976_s20, %s1179_s20   ;;  %s925_s19 = sphi %s974_s19, %s1178_s19   ;;  %s921_s18 = sphi %s972_s18, %s1177_s18  }
   0x6   : > { %s997_s24 = sadd.s32 1, %s933_s21   ;;  %s28_s25 = sadd.s32 1, %s929_s20 }
   0x7   : > { %s25_s26 = ssub.s32 %s933_s21, %s997_s24  ;;  %p35_p0 = scmp.ne.s32.totalorder %s929_s20, %s925_s19 }
   0x8   : > { %p26_p1 = scmp.eq.s32.totalorder %s25_s26, 0  ;;  %p36_p2 = scmp.eq.s32.totalorder %s933_s21, 0 }
   0x9   : > { %p41_p3 = scmp.ne.s32.totalorder %s925_s19, %s921_s18  ;;  %p42_p4 = scmp.eq.s32.totalorder %s993_s22, 0 }
   0xa   : > { %s1009_s27 = scalar_select %p26_p1, %s929_s20, %s28_s25  }
   0xb   : > { %p1011_p5 = por %p36_p2, %p35_p0  ;;  %p1015_p6 = por %p42_p4, %p41_p3 }
   0xc   : > { %p149_p7 = scmp.eq.s32.totalorder %s993_s22, 1  ;;  %p155_p8 = scmp.eq.s32.totalorder %s730_s23, 1 }
   0xd   : > { %s1168_s29 = scalar_select %p1015_p6, 1, 0 }
   0xe   : > { %p768_p10 = scmp.lt.s32.totalorder %s933_s21, 2  ;;  %p1022_p11 = por %p149_p7, %p35_p0 }
   0xf   : > { %p1026_p12 = por %p155_p8, %p41_p3  ;;  %s187_s7 = sand.u32 1, %s929_s20  }
  0x10   : > { %s1169_s30 = scalar_select %p1022_p11, 1, 0 }
  0x11   : > { %s1170_s6 = scalar_select %p1026_p12, 1, 0 }
  0x12   : > { %s754_s8 = sshll.u32 %s933_s21, 9  ;;  %s733_s9 = sshll.u32 %s187_s7, 6 }
  0x13   : > { %s1035_s12 = scalar_lea.hbm %s1159_s0, %s754_s8  ;;  %s191_s13 = scalar_lea.vmem [#allocation2], %s733_s9 }
  0x14   : > { %s198_s14 = sshll.u32 %s191_s13, 4  ;;  %p1039_p13 = pnand %p768_p10, %p1011_p5  ;;  %s1043_s14 = int_to_ptr.vmem [resolvable:$true] %s198_s14 }
  0x15   : > { %s1046_s16 = scalar_lea.sflag [#allocation3], %s187_s7  ;;  %s841_s17 = scalar_lea.hbm %s1035_s12, 1024 }
  0x16   : > { %p842_p1 = scmp.ne.s32.totalorder %s1035_s12, %s841_s17  ;;  %p843_p2 = pneg %p1039_p13 }
  0x17   : > { %s846_s26 = scalar_lea.hbm %s1159_s0, 2048  ;;  %p847_p5 = scmp.lt.s32.totalorder %s1035_s12, %s1159_s0 }
  0x18   : > { %p844_p3 = pnand %p843_p2, %p842_p1  ;;  %p848_p7 = scmp.lt.s32.totalorder %s846_s26, %s841_s17 }
  0x1a   : > { %p845_p4 = pneg %p844_p3  ;;  %p849_p8 = por %p848_p7, %p847_p5 }
  0x1c   : > { %p850_p10 = pnand %p849_p8, %p845_p4 }
  0x1e   : > { %853 = shalt.err (!%p850_p10)
}
  0x1f   : > { %s854_s7 = scalar_lea.vmem %s1043_s14, 1024  ;;  %s935_s9 = smov [#allocation2]  }
  0x20   : > { %p855_p9 = scmp.ne.s32.totalorder %s1043_s14, %s854_s7  ;;  %s859_s10 = sshll.u32 %s935_s9, 4  ;;  %s860_s10 = int_to_ptr.vmem [resolvable:$false] %s859_s10 }
  0x21   : > { %s861_s11 = scalar_lea.vmem %s860_s10, 2048  ;;  %p862_p3 = scmp.lt.s32.totalorder %s1043_s14, %s860_s10 }
  0x22   : > { %p857_p0 = pnand %p855_p9, %p843_p2  ;;  %p863_p12 = scmp.lt.s32.totalorder %s861_s11, %s854_s7 }
  0x24   : > { %p858_p1 = pneg %p857_p0  ;;  %p864_p11 = por %p863_p12, %p862_p3 }
  0x26   : > { %p865_p6 = pnand %p864_p11, %p858_p1 }
  0x28   : > { %868 = shalt.err (!%p865_p6)
}
  0x29   : > { %s936_s13 = smov 1024   ;;  %s937_s17 = smov 512  }
  0x2a   : > { %s938_s23 = smov 32   ;;  %p206_p9 = scmp.lt.s32.totalorder %s933_s21, 3 }
  0x2b   : > { %763 = dma.hbm_to_vmem [thread:$0]  (!%p1039_p13), %s1035_s12, 1024, %s1043_s14, %s1046_s16, %s936_s13, %s937_s17, %s938_s23  }
  0x2c   : > { %p1172_p0 = scmp.ge.s32.totalorder %s933_s21, 1 }
  0x2e   : > { %p207_p2 = pnand %p1172_p0, %p206_p9 }
  0x2f   : > { %s1071_s25 = sand.u32 (!%p207_p2), 1, %s925_s19   ;;  %p1173_p6 = scmp.ne.s32.totalorder (!%p207_p2), %s1168_s29, 0 }
  0x30   : > { %210 = sbr.rel (%p207_p2) target bundleno = 503 (0x1f7), region = 40  ;;  %s737_s26 = sshll.u32 (!%p207_p2), %s1071_s25, 6 }
  0x31   : > { %s213_s28 = scalar_lea.sflag (!%p207_p2), [#allocation3], %s1071_s25  ;;  %s216_s8 = scalar_lea.vmem (!%p207_p2), [#allocation2], %s737_s26 }
  0x35   : > { %912 = dma.done.wait (%p1173_p6), %s213_s28, 1024  }
  0x36   : > { %914 = vsyncadd (%p1173_p6), %s213_s28, 4294966272  ;;  %v939_v0 = vmov 0.0   ;;  %v940_v1 = vmov 0   ;;  %v254_v2 = vld [vmem:[%s216_s8 + $0x28] sm:$0xff]  ;;  %v256_v3 = vld [vmem:[%s216_s8 + $0x38] sm:$0xff]  ;;  %vm281_vm0 = vcmask 130048  }
  0x37   : > { %358 = vmatprep.mubr.f32.mxu0 %v939_v0  ;;  %447 = vmatprep.mubr.f32.mxu1 %v939_v0  ;;  %v253_v4 = vld [vmem:[%s216_s8 + $0x20] sm:$0xff]  ;;  %v255_v5 = vld [vmem:[%s216_s8 + $0x30] sm:$0xff]  ;;  %v250_v6 = vld [vmem:[%s216_s8 + $0x8] sm:$0xff]  ;;  %vm495_vm1 = vcmask 261120   ;;  %s738_s7 = sshll.u32 %s1071_s25, 5  ;;  %s755_s9 = sshll.u32 %s993_s22, 9 }
  0x38   : > { %808 = vset.pattern.permute.xlu1 %v940_v1  ;;  %807 = vset.pattern.permute.xlu0 %v940_v1  ;;  %v252_v7 = vld [vmem:[%s216_s8 + $0x18] sm:$0xff]  ;;  %v249_v8 = vld [vmem:[%s216_s8] sm:$0xff]  ;;  %v251_v9 = vld [vmem:[%s216_s8 + $0x10] sm:$0xff]  ;;  %s242_s10 = scalar_lea.vmem [#allocation5], %s738_s7  ;;  %s1122_s23 = scalar_lea.hbm %s1164_s5, %s755_s9 }
  0x39   : > { %322 = vmatprep.subr.mxu0 %v254_v2  ;;  %411 = vmatprep.subr.mxu1 %v256_v3  ;;  %v245_v10 = vld [vmem:[%s1160_s1] sm:$0xff]  ;;  %v258_v11 = vld [vmem:[%s1161_s2 + $0x8] sm:$0xff]  ;;  %v260_v12 = vld [vmem:[%s1161_s2 + $0x18] sm:$0xff]  ;;  %s660_s11 = sshll.u32 %s242_s10, 4  ;;  %s646_s26 = scalar_lea.sflag [#allocation4], %s1071_s25  ;;  %s661_s11 = int_to_ptr.vmem [resolvable:$true] %s660_s11 }
  0x3a   : > { %323 = vmatpush1.msra.mxu0 %v253_v4  ;;  %412 = vmatpush1.msra.mxu1 %v255_v5  ;;  %v246_v13 = vld [vmem:[%s1160_s1 + $0x8] sm:$0xff]  ;;  %v257_v14 = vld [vmem:[%s1161_s2] sm:$0xff]  ;;  %v259_v15 = vld [vmem:[%s1161_s2 + $0x10] sm:$0xff]  ;;  %s869_s22 = scalar_lea.vmem %s661_s11, 512  ;;  %p1174_p12 = scmp.ne.s32.totalorder %s1169_s30, 0 }
  0x3b   : > { %324 = vmatprep.subr.mxu0 %v250_v6  ;;  %413 = vmatprep.subr.mxu1 %v252_v7  ;;  %v247_v16 = vld [vmem:[%s1160_s1 + $0x10] sm:$0xff]  ;;  %v489_v17 = vld [vmem:[%s1163_s4] sm:$0xff]  ;;  %v248_v18 = vld [vmem:[%s1160_s1 + $0x18] sm:$0xff]  ;;  %p870_p11 = scmp.ne.s32.totalorder %s661_s11, %s869_s22  ;;  %s941_s28 = smov [#allocation5]  }
  0x3c   : > { %325 = vmatpush1.msra.mxu0 %v249_v8  ;;  %414 = vmatpush1.msra.mxu1 %v251_v9  ;;  %v488_v5 = vld [vmem:[%s1162_s3] sm:$0xff]  ;;  %s873_s8 = sshll.u32 %s941_s28, 4  ;;  %s874_s8 = int_to_ptr.vmem [resolvable:$false] %s873_s8 }
  0x3d   : > { %739 = vmatmul.mubr.msk.f32.vlgmr.msra.gmra.mxu0 %vm281_vm0, %v245_v10  ;;  %743 = vmatmul.mubr.msk.f32.vlgmr.msra.gmra.mxu1 %vm281_vm0, %v245_v10  ;;  %p871_p13 = pnand %p870_p11, %p1174_p12  ;;  %s875_s29 = scalar_lea.vmem %s874_s8, 1024 }
  0x3e   : > { %364 = vmatprep.mubr.f32.mxu0 %v939_v0  ;;  %453 = vmatprep.mubr.f32.mxu1 %v939_v0  ;;  %p876_p5 = scmp.lt.s32.totalorder %s661_s11, %s874_s8  ;;  %p877_p7 = scmp.lt.s32.totalorder %s875_s29, %s869_s22 }
  0x3f   : > { %268 = vperm.xlu1 %808, %v258_v11   ;;  %278 = vperm.xlu0 %807, %v260_v12   ;;  %p872_p4 = pneg %p871_p13 }
  0x40   : > { %p878_p8 = por %p877_p7, %p876_p5 }
  0x41   : > { %740 = vmatmul.mubr.msk.f32.gmra.mxu0 %vm281_vm0, %v246_v13  ;;  %744 = vmatmul.mubr.msk.f32.gmra.mxu1 %vm281_vm0, %v246_v13 }
  0x42   : > { %370 = vmatprep.mubr.f32.mxu0 %v939_v0  ;;  %459 = vmatprep.mubr.f32.mxu1 %v939_v0  ;;  %p879_p10 = pnand %p878_p8, %p872_p4 }
  0x43   : > { %263 = vperm.xlu1 %808, %v257_v14   ;;  %273 = vperm.xlu0 %807, %v259_v15  }
  0x45   : > { %741 = vmatmul.mubr.msk.f32.gmra.mxu0 %vm281_vm0, %v247_v16  ;;  %745 = vmatmul.mubr.msk.f32.gmra.mxu1 %vm281_vm0, %v247_v16 }
  0x46   : > { %376 = vmatprep.mubr.f32.mxu0 %v939_v0  ;;  %465 = vmatprep.mubr.f32.mxu1 %v939_v0 }
  0x47   : > { %492 = vperm.xlu0 %807, %v489_v17  }
  0x49   : > { %742 = vmatmul.mubr.msk.f32.gmra.mxu0 %vm281_vm0, %v248_v18  ;;  %746 = vmatmul.mubr.msk.f32.gmra.mxu1 %vm281_vm0, %v248_v18 }
  0x4a   : > { %563 = vmatprep.mubr.f32.mxu0 %v939_v0  ;;  %634 = vmatprep.mubr.f32.mxu1 %v939_v0 }
  0xba   : > { %v269_v19 = vpop.permute.xlu1 %268  ;;  %v279_v22 = vpop.permute.xlu0 %278 }
  0xbe   : > { %v264_v25 = vpop.permute.xlu1 %263  ;;  %v274_v32 = vpop.permute.xlu0 %273 }
  0xc2   : > { %v493_v8 = vpop.permute.xlu0 %492 }
  0xfd   : > { %v360_v20 = vpop.f32.mrf.mxu0  ;;  %v449_v21 = vpop.f32.mrf.mxu1 }
  0xfe   : > { %v361_v28 = vadd.f32 %v360_v20, %v264_v25  ;;  %v450_v54 = vadd.f32 %v449_v21, %v264_v25 }
  0xff   : > { %v362_v23 = vpop.f32.mrf.mxu0  ;;  %v451_v24 = vpop.f32.mrf.mxu1 }
 0x100   : > { %v363_v31 = vadd.f32 %v362_v23, %v264_v25  ;;  %809 = vtanh.f32 %v361_v28  ;;  %v452_v53 = vadd.f32 %v451_v24, %v264_v25 }
 0x101   : > { %v366_v26 = vpop.f32.mrf.mxu0  ;;  %v455_v27 = vpop.f32.mrf.mxu1 }
 0x102   : > { %v367_v33 = vadd.f32 %v366_v26, %v269_v19  ;;  %811 = vtanh.f32 %v363_v31  ;;  %v456_v52 = vadd.f32 %v455_v27, %v269_v19 }
 0x103   : > { %v368_v29 = vpop.f32.mrf.mxu0  ;;  %v457_v30 = vpop.f32.mrf.mxu1 }
 0x104   : > { %v369_v36 = vadd.f32 %v368_v29, %v269_v19  ;;  %813 = vtanh.f32 %v367_v33  ;;  %v458_v51 = vadd.f32 %v457_v30, %v269_v19 }
 0x105   : > { %v372_v34 = vpop.f32.mrf.mxu0  ;;  %v461_v35 = vpop.f32.mrf.mxu1 }
 0x106   : > { %v373_v37 = vadd.f32 %v372_v34, %v274_v32  ;;  %815 = vtanh.f32 %v369_v36  ;;  %v462_v50 = vadd.f32 %v461_v35, %v274_v32 }
 0x107   : > { %v374_v38 = vpop.f32.mrf.mxu0  ;;  %v463_v39 = vpop.f32.mrf.mxu1 }
 0x108   : > { %v375_v40 = vadd.f32 %v374_v38, %v274_v32  ;;  %817 = vtanh.f32 %v373_v37  ;;  %v464_v49 = vadd.f32 %v463_v39, %v274_v32 }
 0x109   : > { %v378_v41 = vpop.f32.mrf.mxu0  ;;  %v467_v42 = vpop.f32.mrf.mxu1 }
 0x10a   : > { %v379_v43 = vadd.f32 %v378_v41, %v279_v22  ;;  %819 = vtanh.f32 %v375_v40  ;;  %v468_v46 = vadd.f32 %v467_v42, %v279_v22 }
 0x10b   : > { %v380_v44 = vpop.f32.mrf.mxu0  ;;  %v469_v45 = vpop.f32.mrf.mxu1 }
 0x10c   : > { %v381_v47 = vadd.f32 %v380_v44, %v279_v22  ;;  %v470_v48 = vadd.f32 %v469_v45, %v279_v22  ;;  %821 = vtanh.f32 %v379_v43 }
 0x10d   : > { %v810_v55 = vpop.eup %809 }
 0x10e   : > { %823 = vtanh.f32 %v381_v47 }
 0x10f   : > { %825 = vtanh.f32 %v470_v48  ;;  %v812_v56 = vpop.eup %811 }
 0x110   : > { %827 = vtanh.f32 %v468_v46 }
 0x111   : > { %829 = vtanh.f32 %v464_v49  ;;  %v814_v57 = vpop.eup %813 }
 0x112   : > { %831 = vtanh.f32 %v462_v50 }
 0x113   : > { %833 = vtanh.f32 %v458_v51  ;;  %v816_v58 = vpop.eup %815 }
 0x114   : > { %835 = vtanh.f32 %v456_v52 }
 0x115   : > { %837 = vtanh.f32 %v452_v53  ;;  %v818_v59 = vpop.eup %817 }
 0x116   : > { %839 = vtanh.f32 %v450_v54 }
 0x117   : > { %v820_v60 = vpop.eup %819 }
 0x119   : > { %v822_v61 = vpop.eup %821 }
 0x11b   : > { %v824_v62 = vpop.eup %823 }
 0x11c   : > { %v826_v63 = vpop.eup %825  ;;  %523 = vmatprep.subr.mxu0 %v824_v62 }
 0x11d   : > { %v828_v0 = vpop.eup %827  ;;  %594 = vmatprep.subr.mxu1 %v826_v63  ;;  %524 = vmatpush1.msra.mxu0 %v822_v61 }
 0x11e   : > { %v830_v1 = vpop.eup %829  ;;  %595 = vmatpush1.msra.mxu1 %v828_v0  ;;  %525 = vmatprep.subr.mxu0 %v820_v60 }
 0x11f   : > { %v832_v2 = vpop.eup %831  ;;  %596 = vmatprep.subr.mxu1 %v830_v1  ;;  %526 = vmatpush1.msra.mxu0 %v818_v59 }
 0x120   : > { %v834_v3 = vpop.eup %833  ;;  %597 = vmatpush1.msra.mxu1 %v832_v2  ;;  %527 = vmatprep.subr.mxu0 %v816_v58 }
 0x121   : > { %v836_v4 = vpop.eup %835  ;;  %598 = vmatprep.subr.mxu1 %v834_v3  ;;  %528 = vmatpush1.msra.mxu0 %v814_v57 }
 0x122   : > { %v838_v6 = vpop.eup %837  ;;  %599 = vmatpush1.msra.mxu1 %v836_v4  ;;  %529 = vmatprep.subr.mxu0 %v812_v56 }
 0x123   : > { %v840_v7 = vpop.eup %839  ;;  %600 = vmatprep.subr.mxu1 %v838_v6  ;;  %530 = vmatpush1.msra.mxu0 %v810_v55 }
 0x124   : > { %601 = vmatpush1.msra.mxu1 %v840_v7  ;;  %747 = vmatmul.mubr.msk.f32.vlgmr.msra.gmra.mxu0 %vm495_vm1, %v488_v5 }
 0x125   : > { %748 = vmatmul.mubr.msk.f32.vlgmr.msra.gmra.mxu1 %vm495_vm1, %v488_v5 }
 0x1e4   : > { %v565_v9 = vpop.f32.mrf.mxu0 }
 0x1e5   : > { %v566_v10 = vadd.f32 %v565_v9, %v493_v8  ;;  %v636_v11 = vpop.f32.mrf.mxu1 }
 0x1e6   : > { %v637_v12 = vadd.f32 %v636_v11, %v493_v8  ;;  %v567_v13 = vpop.f32.mrf.mxu0 }
 0x1e7   : > { %641 = vst [vmem:[%s242_s10] sm:$0xff] %v566_v10  ;;  %v568_v14 = vadd.f32 %v567_v13, %v493_v8  ;;  %v638_v15 = vpop.f32.mrf.mxu1 }
 0x1e8   : > { %643 = vst [vmem:[%s242_s10 + $0x10] sm:$0xff] %v637_v12  ;;  %v639_v16 = vadd.f32 %v638_v15, %v493_v8 }
 0x1e9   : > { %642 = vst [vmem:[%s242_s10 + $0x8] sm:$0xff] %v568_v14 }
 0x1ea   : > { %644 = vst [vmem:[%s242_s10 + $0x18] sm:$0xff] %v639_v16 }
 0x1eb   : > { %882 = shalt.err (!%p879_p10)
}
 0x1ec   : > { %s883_s12 = scalar_lea.hbm %s1122_s23, 512  ;;  %s887_s15 = scalar_lea.hbm %s1164_s5, 1024 }
 0x1ed   : > { %p884_p1 = scmp.ne.s32.totalorder %s1122_s23, %s883_s12  ;;  %p888_p0 = scmp.lt.s32.totalorder %s1122_s23, %s1164_s5 }
 0x1ee   : > { %p889_p2 = scmp.lt.s32.totalorder %s887_s15, %s883_s12 }
 0x1ef   : > { %p885_p3 = pnand %p884_p1, %p1174_p12 }
 0x1f0   : > { %p890_p6 = por %p889_p2, %p888_p0 }
 0x1f1   : > { %p886_p9 = pneg %p885_p3 }
 0x1f3   : > { %p891_p11 = pnand %p890_p6, %p886_p9 }
 0x1f5   : > { %894 = shalt.err (!%p891_p11)
}
 0x1f6   : > { %758 = dma.vmem_to_hbm [thread:$0]  (%p1174_p12), %s661_s11, 512, %s1122_s23, %s646_s26  }
 0x1f7 PF: > { %s672_s9 = sand.u32 1, %s921_s18   ;;  %p1175_p13 = scmp.ne.s32.totalorder %s1170_s6, 0 }
 0x1f8   : > { %p1176_p4 = scmp.ge.s32.totalorder %s933_s21, 2  ;;  %s673_s10 = scalar_lea.sflag [#allocation4], %s672_s9 }
 0x1fa   : > { %p765_p5 = pnand %p1176_p4, %p1175_p13 }
 0x1fc   : > { %p766_p7 = pneg %p765_p5 }
 0x1fe   : > { %916 = dma.done.wait (%p766_p7), %s673_s10, 512  }
 0x1ff   : > { %918 = vsyncadd (%p766_p7), %s673_s10, 4294966784  ;;  %p18_p8 = scmp.ge.s32.totalorder %s997_s24, 4   ;;  %s1177_s18 = smov %s925_s19 }
 0x200   : > { %s1178_s19 = smov %s929_s20  ;;  %s1179_s20 = smov %s1009_s27 }
 0x201   : > { %s1180_s21 = smov %s997_s24  ;;  %20 = sbr.rel (!%p18_p8) target bundleno = 5 (0x5), region = 85 }
 0x206   :  { %678 = vsyncpa [#allocation3], 1 }
 0x207   :  { %680 = vsyncpa [#allocation3 + $0x1], 1 }
 0x208   :  { %681 = vsyncpa [#allocation4], 1 }
 0x209   :  { %683 = vsyncpa [#allocation4 + $0x1], 1 }

</bundles_post_ra>
